<compile_context>
chip_gen: v7x
topology: tpu7x:2x2x1
jax: 0.10.0
libtpu: 0.0.40
codegen_flags: <defaults>
</compile_context>

<pallas_src>
import jax
import jax.numpy as jnp
from jax.experimental import pallas as pl
from jax.experimental.pallas import tpu as pltpu  # noqa: F401  (TPU backend)


def _postprocess_kernel(logits_ref, boxes_ref, scale_ref, boxes_out_ref, scores_ref):
    # scores = sigmoid(logits[..., 0])  -> (N, 1); sigmoid lands on the EUP.
    scores_ref[...] = jax.nn.sigmoid(
        logits_ref[:, 0:1].astype(jnp.float32)
    ).astype(scores_ref.dtype)

    # boxes: (N, 4) cxcywh normalized.  Scale columns by [W, H, W, H]
    # (runtime data, broadcast over sublanes) and convert cxcywh -> xywh.
    b = boxes_ref[...].astype(jnp.float32)      # (N, 4)
    s = scale_ref[...].astype(jnp.float32)      # (1, 4) = [W, H, W, H]
    bs = b * s                                  # (N, 4), broadcast multiply
    wh = bs[:, 2:4]                             # (N, 2) = (w, h)
    xy = bs[:, 0:2] - 0.5 * wh                  # (N, 2) = (x0, y0)
    boxes_out_ref[:, 0:2] = xy.astype(boxes_out_ref.dtype)
    boxes_out_ref[:, 2:4] = wh.astype(boxes_out_ref.dtype)


def tracker_post_process(pred_logits, pred_boxes, target_size):
    """Pallas equivalent of TrackerPostProcess.forward.

    pred_logits: (N, C) float
    pred_boxes : (N, 4) float, cxcywh normalized to [0, 1]
    target_size: (img_h, img_w) — Python ints or JAX scalars (no recompile per size)
    Returns (boxes (N, 4) xywh in pixels, scores (N,), labels (N,) zeros).
    """
    n, c = pred_logits.shape
    img_h, img_w = target_size

    # Runtime scale row — a data input, never a baked-in kernel constant.
    scale = jnp.asarray(
        [img_w, img_h, img_w, img_h], dtype=pred_boxes.dtype
    ).reshape(1, 4)

    out_shapes = (
        jax.ShapeDtypeStruct((n, 4), pred_boxes.dtype),   # boxes (xywh, pixels)
        jax.ShapeDtypeStruct((n, 1), pred_logits.dtype),  # scores column
    )

    boxes, scores_col = pl.pallas_call(
        _postprocess_kernel,
        out_shape=out_shapes,
        # Single full-array block, no grid: block shape == array shape, so the
        # (8, 128) divisibility rule does not apply and the whole workload
        # (<1 KiB) fits VMEM trivially on v5e/v6e/v7x.  A grid would only add
        # per-step overhead for a ~10-bundle body.
        in_specs=[
            pl.BlockSpec((n, c), lambda: (0, 0)),
            pl.BlockSpec((n, 4), lambda: (0, 0)),
            pl.BlockSpec((1, 4), lambda: (0, 0)),
        ],
        out_specs=(
            pl.BlockSpec((n, 4), lambda: (0, 0)),
            pl.BlockSpec((n, 1), lambda: (0, 0)),
        ),
    )(pred_logits, pred_boxes, scale)

    scores = scores_col.reshape(n)
    # torch.full_like(scores, 0) -> float zeros; constant, no kernel work needed.
    labels = jnp.zeros_like(scores)
    return boxes, scores, labels


def _reference(pred_logits, pred_boxes, target_size):
    img_h, img_w = target_size
    scores = jax.nn.sigmoid(pred_logits[..., 0])
    scale = jnp.asarray([img_w, img_h, img_w, img_h], dtype=pred_boxes.dtype)
    b = pred_boxes * scale[None, :]
    cx, cy, w, h = b[:, 0], b[:, 1], b[:, 2], b[:, 3]
    boxes = jnp.stack([cx - 0.5 * w, cy - 0.5 * h, w, h], axis=-1)
    labels = jnp.zeros_like(scores)
    return boxes, scores, labels


if __name__ == "__main__":
    key = jax.random.PRNGKey(0)
    k1, k2 = jax.random.split(key)

    N, C = 8, 4                      # 8 track queries, 4 classes
    target_size = (480, 640)         # (img_h, img_w)

    pred_logits = jax.random.normal(k1, (N, C), dtype=jnp.float32)
    pred_boxes = jax.random.uniform(k2, (N, 4), dtype=jnp.float32)  # cxcywh in [0,1]

    boxes, scores, labels = tracker_post_process(pred_logits, pred_boxes, target_size)
    jax.block_until_ready((boxes, scores, labels))

    ref_boxes, ref_scores, ref_labels = _reference(pred_logits, pred_boxes, target_size)
    assert jnp.allclose(boxes, ref_boxes, atol=1e-5, rtol=1e-5)
    assert jnp.allclose(scores, ref_scores, atol=1e-6, rtol=1e-6)
    assert jnp.allclose(labels, ref_labels)

    print("KERNEL_OK")
</pallas_src>

<mosaic_0001>
module attributes {stable_mosaic.version = 11 : i64} {
  func.func @_postprocess_kernel(%arg0: memref<8x4xf32, #tpu.memory_space<vmem>>, %arg1: memref<8x4xf32, #tpu.memory_space<vmem>>, %arg2: memref<1x4xf32, #tpu.memory_space<vmem>>, %arg3: memref<8x4xf32, #tpu.memory_space<vmem>>, %arg4: memref<8x1xf32, #tpu.memory_space<vmem>>) attributes {dimension_semantics = [], scalar_prefetch = 0 : i64, scratch_operands = 0 : i64, tpu.core_type = #tpu.core_type<tc>} {
    %c0 = arith.constant 0 : index
    %c0_0 = arith.constant 0 : index
    %0 = vector.load %arg0[%c0, %c0_0] : memref<8x4xf32, #tpu.memory_space<vmem>>, vector<8x1xf32>
    %1 = arith.negf %0 : vector<8x1xf32>
    %2 = math.exp %1 : vector<8x1xf32>
    %cst = arith.constant 1.000000e+00 : f32
    %3 = vector.broadcast %cst : f32 to vector<8x1xf32>
    %4 = arith.addf %3, %2 : vector<8x1xf32>
    %5 = arith.divf %3, %4 : vector<8x1xf32>
    %c0_1 = arith.constant 0 : index
    %c0_2 = arith.constant 0 : index
    %6 = vector.load %arg4[%c0_1, %c0_2] : memref<8x1xf32, #tpu.memory_space<vmem>>, vector<8x1xf32>
    tpu.vector_store %arg4[%c0_1, %c0_2], %5 {strides = array<i32>} : memref<8x1xf32, #tpu.memory_space<vmem>>, vector<8x1xf32>,
    %c0_3 = arith.constant 0 : index
    %c0_4 = arith.constant 0 : index
    %7 = vector.load %arg1[%c0_3, %c0_4] : memref<8x4xf32, #tpu.memory_space<vmem>>, vector<8x4xf32>
    %c0_5 = arith.constant 0 : index
    %c0_6 = arith.constant 0 : index
    %8 = vector.load %arg2[%c0_5, %c0_6] : memref<1x4xf32, #tpu.memory_space<vmem>>, vector<1x4xf32>
    %9 = vector.broadcast %8 : vector<1x4xf32> to vector<8x4xf32>
    %10 = arith.mulf %7, %9 : vector<8x4xf32>
    %11 = vector.extract_strided_slice %10 {offsets = [0, 2], sizes = [8, 2], strides = [1, 1]} : vector<8x4xf32> to vector<8x2xf32>
    %12 = vector.extract_strided_slice %10 {offsets = [0, 0], sizes = [8, 2], strides = [1, 1]} : vector<8x4xf32> to vector<8x2xf32>
    %cst_7 = arith.constant 5.000000e-01 : f32
    %13 = vector.broadcast %cst_7 : f32 to vector<8x2xf32>
    %14 = arith.mulf %13, %11 : vector<8x2xf32>
    %15 = arith.subf %12, %14 : vector<8x2xf32>
    %c0_8 = arith.constant 0 : index
    %c0_9 = arith.constant 0 : index
    %16 = vector.load %arg3[%c0_8, %c0_9] : memref<8x4xf32, #tpu.memory_space<vmem>>, vector<8x2xf32>
    tpu.vector_store %arg3[%c0_8, %c0_9], %15 {strides = array<i32>} : memref<8x4xf32, #tpu.memory_space<vmem>>, vector<8x2xf32>,
    %c0_10 = arith.constant 0 : index
    %c2 = arith.constant 2 : index
    %17 = vector.load %arg3[%c0_10, %c2] : memref<8x4xf32, #tpu.memory_space<vmem>>, vector<8x2xf32>
    tpu.vector_store %arg3[%c0_10, %c2], %11 {strides = array<i32>} : memref<8x4xf32, #tpu.memory_space<vmem>>, vector<8x2xf32>,
    return
  }
}

</mosaic_0001>

<bundles_post_ra>
// kernel: tpu_custom_call.1
= control target key start
LH: loop header
LB: loop body
LE: loop exit
PB: predicated region body
PF: predicated region fallthrough
CT: control target
= control target key end

     0   :  { %s59_s21 = smov 126   ;;  %vm23_vm0 = vcmask 7168   ;;  %vm40_vm1 = vcmask 15360   ;;  %vm42_vm2 = vcmask 31760   ;;  %s103_s0 = inlined_call_operand.vmem [shape: f32[8,4], index: 0, kind: input, shape index: {}]   ;;  %s104_s1 = inlined_call_operand.vmem [shape: f32[8,4], index: 1, kind: input, shape index: {}]   ;;  %s105_s2 = inlined_call_operand.vmem [shape: f32[1,4], index: 2, kind: input, shape index: {}]   ;;  %s106_s4 = inlined_call_operand.vmem [shape: f32[8,1], index: 4, kind: output, shape index: {1}]   ;;  %s107_s3 = inlined_call_operand.vmem [shape: f32[8,4], index: 3, kind: output, shape index: {0}]  }
   0x1   :  { %v16_v0 = vld [vmem:[%s103_s0] sm:$0xff] }
   0x2   :  { %v25_v1 = vld [vmem:[%s104_s1] sm:$0xff]  ;;  %v52_v3 = vmul.f32 -1.442695, %v16_v0 }
   0x3   :  { %v53_v2 = vld [vmem:[%s105_s2] ss:$0 sm:$0xff] }
   0x4   :  { %v33_v4 = vmul.f32 %v53_v2, %v25_v1  ;;  %55 = vpow2.f32 %v52_v3 }
   0x6   :  { %v34_v5 = vmul.f32 0.5, %v33_v4 }
   0x8   :  { %36 = vrot.lane.b32.xlu0 %v34_v5, %s59_s21 }
   0xe   :  { %v56_v6 = vpop.eup %55 }
   0xf   :  { %v20_v7 = vadd.f32 1.0, %v56_v6 }
  0x11   :  { %57 = vrcp.f32 %v20_v7 }
  0x1b   :  { %v58_v8 = vpop.eup %57 }
  0x1c   :  { %24 = vst.msk [vmem:[%s106_s4] sm:$0xff] %vm23_vm0, %v58_v8 }
  0x7a   :  { %v37_v9 = vpop.permute.xlu0 %36 }
  0x7b   :  { %v39_v10 = vsub.f32 %v33_v4, %v37_v9 }
  0x7d   :  { %41 = vst.msk [vmem:[%s107_s3] sm:$0xff] %vm40_vm1, %v39_v10 }
  0x7e   :  { %43 = vst.msk [vmem:[%s107_s3] sm:$0xff] %vm42_vm2, %v33_v4 }

</bundles_post_ra>
